<compile_context>
chip_gen: v5e
topology: v5e:2x2
jax: 0.10.0
libtpu: 0.0.40
codegen_flags: <defaults>
</compile_context>

<pallas_src>
import functools

import jax
import jax.numpy as jnp
from jax import lax
from jax.experimental import pallas as pl
from jax.experimental.pallas import tpu as pltpu


def dkconv_kernel(x_ref, w_ref, b_ref, o_ref, *, HWp, Wp, k, p, neg_slope):
    """Per-batch-element block.

    x_ref: (C_in, HWp + 2*S)  zero-extended, flattened, spatially padded image
    w_ref: (C_out, k*k*C_in)  lane-dense folded weights
    b_ref: (C_out, 1)
    o_ref: (C_out, HWp)       conv output in padded flat coordinates
    """
    S = p * Wp + p
    x = x_ref[...]                                    # (C_in, HWp + 2S)

    # Build the folded (k*k*C_in, HWp) operand: each tap is a static slice of
    # the extended flat image (constant shift oy*Wp + ox in padded coords).
    taps = []
    for dy in range(k):
        for dx in range(k):
            s = (dy - p) * Wp + (dx - p)              # flat shift for this tap
            taps.append(x[:, S + s: S + s + HWp])     # (C_in, HWp)
    stacked = jnp.concatenate(taps, axis=0)           # (k*k*C_in, HWp)

    # Single MXU matmul, f32 accumulation, default (single-pass) precision.
    y = jnp.dot(w_ref[...], stacked, preferred_element_type=jnp.float32)
    y = y + b_ref[...].astype(jnp.float32)            # lane-broadcast bias
    y = jnp.where(y >= 0, y, y * neg_slope)           # LeakyReLU
    o_ref[...] = y.astype(o_ref.dtype)


def dkconv(x, weight, bias, neg_slope=0.1):
    """x: (B, C, H, W) NCHW.  weight: (C, C, k, k).  bias: (C,).  Returns NCHW."""
    B, C, H, W = x.shape
    C_out, C_in, k, k2 = weight.shape
    assert k == k2 and C_in == C and C_out == C
    p = k // 2
    Hp, Wp = H + 2 * p, W + 2 * p
    HWp = Hp * Wp
    S = p * Wp + p                                     # max |flat tap shift|

    # Host-side padding (one cheap mem-bound pass): spatial zero pad, flatten,
    # then extend the flat axis by S zeros on both ends so every tap slice in
    # the kernel is in-bounds and static.
    xp = jnp.pad(x, ((0, 0), (0, 0), (p, p), (p, p))).reshape(B, C, HWp)
    x_ext = jnp.pad(xp, ((0, 0), (0, 0), (S, S)))      # (B, C, HWp + 2S)

    # Folded, lane-dense weights: column order (dy, dx, ci) must match the
    # tap-stacking order in the kernel.
    w2 = jnp.transpose(weight, (0, 2, 3, 1)).reshape(C_out, k * k * C_in)
    b_col = bias.reshape(C_out, 1)

    kernel = functools.partial(dkconv_kernel, HWp=HWp, Wp=Wp, k=k, p=p,
                               neg_slope=float(neg_slope))

    out = pl.pallas_call(
        kernel,
        out_shape=jax.ShapeDtypeStruct((B, C_out, HWp), x.dtype),
        grid_spec=pltpu.PrefetchScalarGridSpec(
            num_scalar_prefetch=0,
            grid=(B,),
            in_specs=[
                pl.BlockSpec((None, C, HWp + 2 * S), lambda b: (b, 0, 0)),
                pl.BlockSpec((C_out, k * k * C_in), lambda b: (0, 0)),
                pl.BlockSpec((C_out, 1), lambda b: (0, 0)),
            ],
            out_specs=pl.BlockSpec((None, C_out, HWp), lambda b: (b, 0, 0)),
        ),
        compiler_params=pltpu.CompilerParams(
            dimension_semantics=("parallel",)),
    )(x_ext, w2, b_col)

    # Drop the (unused) padded border ring -> NCHW output. Free-ish slice.
    return out.reshape(B, C_out, Hp, Wp)[:, :, p:p + H, p:p + W]


def reference(x, weight, bias, neg_slope=0.1):
    """Pure-JAX reference matching PyTorch Conv2d(padding=k//2) + LeakyReLU."""
    B, C_in, H, W = x.shape
    C_out, _, k, _ = weight.shape
    p = k // 2
    xp = jnp.pad(x, ((0, 0), (0, 0), (p, p), (p, p)))
    y = jnp.zeros((B, C_out, H, W), jnp.float32)
    for dy in range(k):
        for dx in range(k):
            patch = xp[:, :, dy:dy + H, dx:dx + W]    # (B, C_in, H, W)
            w_t = weight[:, :, dy, dx]                # (C_out, C_in)
            y = y + jnp.einsum('oi,bihw->bohw', w_t, patch,
                               precision=lax.Precision.HIGHEST)
    y = y + bias.reshape(1, C_out, 1, 1)
    return jnp.where(y >= 0, y, neg_slope * y).astype(x.dtype)


if __name__ == "__main__":
    # Small shapes consistent with the module (channels, odd kernel size).
    B, C, H, W = 2, 4, 16, 16
    k = 3
    neg_slope = 0.1

    key = jax.random.PRNGKey(0)
    kx, kw, kb = jax.random.split(key, 3)

    x = jax.random.normal(kx, (B, C, H, W), dtype=jnp.float32)
    fan_in = C * k * k
    weight = jax.random.normal(kw, (C, C, k, k), dtype=jnp.float32) / jnp.sqrt(fan_in)
    bias = jax.random.normal(kb, (C,), dtype=jnp.float32) * 0.1

    out = dkconv(x, weight, bias, neg_slope=neg_slope)
    out = jax.block_until_ready(out)

    ref = reference(x, weight, bias, neg_slope=neg_slope)
    assert out.shape == (B, C, H, W)
    # Tolerance covers single-pass (default-precision) MXU rounding of the
    # folded f32 matmul; structural bugs (wrong tap offset, weight ordering,
    # padded-coordinate slicing, bias) would produce O(0.1..1) errors.
    err = jnp.max(jnp.abs(out - ref))
    assert jnp.allclose(out, ref, atol=2e-2, rtol=2e-2), f"max err {err}"

    print("KERNEL_OK")
</pallas_src>

<mosaic_0001>
module attributes {stable_mosaic.version = 11 : i64} {
  func.func @dkconv_kernel(%arg0: i32, %arg1: memref<1x4x362xf32, #tpu.memory_space<vmem>>, %arg2: memref<4x36xf32, #tpu.memory_space<vmem>>, %arg3: memref<4x1xf32, #tpu.memory_space<vmem>>, %arg4: memref<1x4x324xf32, #tpu.memory_space<vmem>>) attributes {dimension_semantics = [#tpu.dimension_semantics<parallel>], iteration_bounds = array<i64: 2>, scalar_prefetch = 0 : i64, scratch_operands = 0 : i64, tpu.core_type = #tpu.core_type<tc>, window_params = [{transform_indices = @transform_0, window_bounds = array<i64: 1, 4, 362>}, {pipeline_mode = #tpu.pipeline_mode<synchronous>, transform_indices = @transform_1, window_bounds = array<i64: 4, 36>}, {pipeline_mode = #tpu.pipeline_mode<synchronous>, transform_indices = @transform_2, window_bounds = array<i64: 4, 1>}, {transform_indices = @transform_3, window_bounds = array<i64: 1, 4, 324>}]} {
    %c0 = arith.constant 0 : index
    %c0_0 = arith.constant 0 : index
    %c0_1 = arith.constant 0 : index
    %0 = vector.load %arg1[%c0, %c0_0, %c0_1] : memref<1x4x362xf32, #tpu.memory_space<vmem>>, vector<1x4x362xf32>
    %1 = vector.shape_cast %0 : vector<1x4x362xf32> to vector<4x362xf32>
    %2 = vector.extract_strided_slice %1 {offsets = [0, 0], sizes = [4, 324], strides = [1, 1]} : vector<4x362xf32> to vector<4x324xf32>
    %3 = vector.extract_strided_slice %1 {offsets = [0, 1], sizes = [4, 324], strides = [1, 1]} : vector<4x362xf32> to vector<4x324xf32>
    %4 = vector.extract_strided_slice %1 {offsets = [0, 2], sizes = [4, 324], strides = [1, 1]} : vector<4x362xf32> to vector<4x324xf32>
    %5 = vector.extract_strided_slice %1 {offsets = [0, 18], sizes = [4, 324], strides = [1, 1]} : vector<4x362xf32> to vector<4x324xf32>
    %6 = vector.extract_strided_slice %1 {offsets = [0, 19], sizes = [4, 324], strides = [1, 1]} : vector<4x362xf32> to vector<4x324xf32>
    %7 = vector.extract_strided_slice %1 {offsets = [0, 20], sizes = [4, 324], strides = [1, 1]} : vector<4x362xf32> to vector<4x324xf32>
    %8 = vector.extract_strided_slice %1 {offsets = [0, 36], sizes = [4, 324], strides = [1, 1]} : vector<4x362xf32> to vector<4x324xf32>
    %9 = vector.extract_strided_slice %1 {offsets = [0, 37], sizes = [4, 324], strides = [1, 1]} : vector<4x362xf32> to vector<4x324xf32>
    %10 = vector.extract_strided_slice %1 {offsets = [0, 38], sizes = [4, 324], strides = [1, 1]} : vector<4x362xf32> to vector<4x324xf32>
    %11 = tpu.concatenate %2, %3, %4, %5, %6, %7, %8, %9, %10 in 0 : vector<4x324xf32>, vector<4x324xf32>, vector<4x324xf32>, vector<4x324xf32>, vector<4x324xf32>, vector<4x324xf32>, vector<4x324xf32>, vector<4x324xf32>, vector<4x324xf32> -> vector<36x324xf32>
    %c0_2 = arith.constant 0 : index
    %c0_3 = arith.constant 0 : index
    %12 = vector.load %arg2[%c0_2, %c0_3] : memref<4x36xf32, #tpu.memory_space<vmem>>, vector<4x36xf32>
    %cst = arith.constant dense<0.000000e+00> : vector<4x324xf32>
    %13 = tpu.matmul %12, %11, %cst {dimension_numbers = #tpu.dot_dimension_numbers<[1], [0], [0], [1], [0, 0, 1, 1], [], []>} : vector<4x36xf32>, vector<36x324xf32>, vector<4x324xf32> -> vector<4x324xf32>
    %c0_4 = arith.constant 0 : index
    %c0_5 = arith.constant 0 : index
    %14 = vector.load %arg3[%c0_4, %c0_5] : memref<4x1xf32, #tpu.memory_space<vmem>>, vector<4x1xf32>
    %15 = vector.broadcast %14 : vector<4x1xf32> to vector<4x324xf32>
    %16 = arith.addf %13, %15 : vector<4x324xf32>
    %cst_6 = arith.constant 0.000000e+00 : f32
    %17 = vector.broadcast %cst_6 : f32 to vector<4x324xf32>
    %18 = arith.cmpf oge, %16, %17 : vector<4x324xf32>
    %cst_7 = arith.constant 1.000000e-01 : f32
    %19 = vector.broadcast %cst_7 : f32 to vector<4x324xf32>
    %20 = arith.mulf %16, %19 : vector<4x324xf32>
    %21 = arith.select %18, %16, %20 : vector<4x324xi1>, vector<4x324xf32>
    %c0_8 = arith.constant 0 : index
    %c0_9 = arith.constant 0 : index
    %c0_10 = arith.constant 0 : index
    %22 = vector.load %arg4[%c0_8, %c0_9, %c0_10] : memref<1x4x324xf32, #tpu.memory_space<vmem>>, vector<1x4x324xf32>
    %23 = vector.shape_cast %22 : vector<1x4x324xf32> to vector<4x324xf32>
    %24 = vector.shape_cast %21 : vector<4x324xf32> to vector<1x4x324xf32>
    tpu.vector_store %arg4[%c0_8, %c0_9, %c0_10], %24 {strides = array<i32>} : memref<1x4x324xf32, #tpu.memory_space<vmem>>, vector<1x4x324xf32>,
    return
  }
  func.func @transform_0(%arg0: i32) -> (i32, i32, i32) {
    %c0_i32 = arith.constant 0 : i32
    %c0_i32_0 = arith.constant 0 : i32
    %c0_i32_1 = arith.constant 0 : i32
    return %arg0, %c0_i32, %c0_i32_0 : i32, i32, i32
  }
  func.func @transform_1(%arg0: i32) -> (i32, i32) {
    %c0_i32 = arith.constant 0 : i32
    %c0_i32_0 = arith.constant 0 : i32
    %c0_i32_1 = arith.constant 0 : i32
    return %c0_i32, %c0_i32_0 : i32, i32
  }
  func.func @transform_2(%arg0: i32) -> (i32, i32) {
    %c0_i32 = arith.constant 0 : i32
    %c0_i32_0 = arith.constant 0 : i32
    %c0_i32_1 = arith.constant 0 : i32
    return %c0_i32, %c0_i32_0 : i32, i32
  }
  func.func @transform_3(%arg0: i32) -> (i32, i32, i32) {
    %c0_i32 = arith.constant 0 : i32
    %c0_i32_0 = arith.constant 0 : i32
    %c0_i32_1 = arith.constant 0 : i32
    return %arg0, %c0_i32, %c0_i32_0 : i32, i32, i32
  }
}

</mosaic_0001>

<bundles_post_ra>
// kernel: tpu_custom_call.1
= control target key start
LH: loop header
LB: loop body
LE: loop exit
PB: predicated region body
PF: predicated region fallthrough
CT: control target
= control target key end

     0   :  { %8 = vsyncpa [#allocation3], 0  ;;  %s988_s0 = inlined_call_operand.hbm [shape: f32[2,4,362], index: 0, kind: input, shape index: {}]   ;;  %s989_s1 = inlined_call_operand.vmem [shape: f32[4,36], index: 1, kind: input, shape index: {}]   ;;  %s990_s2 = inlined_call_operand.vmem [shape: f32[4,1], index: 2, kind: input, shape index: {}]   ;;  %s991_s3 = inlined_call_operand.hbm [shape: f32[2,4,324], index: 3, kind: output, shape index: {}]  }
   0x1   :  { %10 = vsyncpa [#allocation3 + $0x1], 0 }
   0x2   :  { %11 = vsyncpa [#allocation4], 0 }
   0x3   :  { %13 = vsyncpa [#allocation4 + $0x1], 0  ;;  %s778_s12 = smov 0   ;;  %s780_s13 = smov 0  }
   0x4   :  { %s782_s14 = smov 0   ;;  %s784_s15 = smov 0  }
   0x5 LB: > { %s799_s16 = sadd.s32 4294967295, %s747_s15   ;;  %s541_s17 = sadd.s32 4294967294, %s747_s15   ;;  %s747_s15 = sphi %s784_s15, %s999_s15   ;;  %s743_s14 = sphi %s782_s14, %s998_s14   ;;  %s739_s13 = sphi %s780_s13, %s997_s13   ;;  %s735_s12 = sphi %s778_s12, %s996_s12  }
   0x6   : > { %s803_s18 = sadd.s32 1, %s747_s15   ;;  %s26_s19 = sadd.s32 1, %s743_s14 }
   0x7   : > { %s23_s20 = ssub.s32 %s747_s15, %s803_s18  ;;  %p33_p0 = scmp.ne.s32.totalorder %s743_s14, %s739_s13 }
   0x8   : > { %p24_p1 = scmp.eq.s32.totalorder %s23_s20, 0  ;;  %p34_p2 = scmp.eq.s32.totalorder %s747_s15, 0 }
   0x9   : > { %p39_p3 = scmp.ne.s32.totalorder %s739_s13, %s735_s12  ;;  %p40_p4 = scmp.eq.s32.totalorder %s799_s16, 0 }
   0xa   : > { %s815_s21 = scalar_select %p24_p1, %s743_s14, %s26_s19  }
   0xb   : > { %p35_p5 = por %p34_p2, %p33_p0  ;;  %p817_p6 = por %p40_p4, %p39_p3 }
   0xc   : > { %p105_p7 = scmp.eq.s32.totalorder %s799_s16, 1  ;;  %p111_p8 = scmp.eq.s32.totalorder %s541_s17, 1 }
   0xd   : > { %p543_p9 = scmp.ge.s32.totalorder %s747_s15, 2  ;;  %p571_p10 = scmp.lt.s32.totalorder %s747_s15, 2 }
   0xe   : > { %p824_p11 = por %p105_p7, %p33_p0  ;;  %p828_p12 = por %p111_p8, %p39_p3 }
   0xf   : > { %s137_s25 = sand.u32 1, %s743_s14   ;;  %s556_s26 = smul.u32 12, %s747_s15 }
  0x10   : > { %s555_s27 = smul.u32 12, %s137_s25  ;;  %p837_p13 = pnand %p571_p10, %p35_p5 }
  0x11   : > { %s146_s30 = scalar_lea.hbm %s988_s0, %s556_s26  ;;  %s138_s8 = scalar_lea.sflag [#allocation3], %s137_s25 }
  0x12   : > { %s148_s5 = sshll.u32 %s146_s30, 4  ;;  %s141_s6 = scalar_lea.vmem [#allocation2], %s555_s27  ;;  %s149_s5 = int_to_ptr.hbm [resolvable:$true] %s148_s5 }
  0x13   : > { %s150_s7 = sshll.u32 %s141_s6, 4  ;;  %s651_s9 = sshra.s32 %s149_s5, 4  ;;  %s151_s7 = int_to_ptr.vmem [resolvable:$true] %s150_s7  ;;  %s652_s9 = int_to_ptr.hbm [resolvable:$true] %s651_s9 }
  0x14   : > { %s653_s10 = scalar_lea.hbm %s652_s9, 12  ;;  %p655_p1 = pneg %p837_p13 }
  0x15   : > { %p654_p0 = scmp.ne.s32.totalorder %s652_s9, %s653_s10  ;;  %s658_s19 = scalar_lea.hbm %s988_s0, 24 }
  0x16   : > { %p659_p4 = scmp.lt.s32.totalorder %s652_s9, %s988_s0  ;;  %p660_p5 = scmp.lt.s32.totalorder %s658_s19, %s653_s10 }
  0x17   : > { %p656_p2 = pnand %p655_p1, %p654_p0 }
  0x18   : > { %p661_p7 = por %p660_p5, %p659_p4 }
  0x19   : > { %p657_p3 = pneg %p656_p2 }
  0x1b   : > { %p662_p8 = pnand %p661_p7, %p657_p3 }
  0x1d   : > { %665 = shalt.err (!%p662_p8)
}
  0x1e   : > { %566 = dma.hbm_to_vmem [thread:$0]  (!%p837_p13), %s149_s5, 192, %s151_s7, %s138_s8  }
  0x1f   : > { %p545_p10 = scmp.ge.s32.totalorder %s747_s15, 1  ;;  %p155_p0 = scmp.lt.s32.totalorder %s747_s15, 3 }
  0x21   : > { %p156_p1 = pnand %p545_p10, %p155_p0 }
  0x22   : > { %s854_s25 = sand.u32 (!%p156_p1), 1, %s739_s13  }
  0x23   : > { %159 = sbr.rel (%p156_p1) target bundleno = 394 (0x18a), region = 32  ;;  %s162_s28 = scalar_lea.sflag (!%p156_p1), [#allocation3], %s854_s25 }
  0x24   : > { %s557_s27 = smul.u32 (!%p156_p1), 12, %s854_s25 }
  0x26   : > { %s165_s29 = scalar_lea.vmem (!%p156_p1), [#allocation2], %s557_s27 }
  0x28   : > { %726 = dma.done.wait (%p817_p6), %s162_s28, 192  }
  0x29   : > { %728 = vsyncadd (%p817_p6), %s162_s28, 4294967104  ;;  %v189_v0 = vld [vmem:[%s165_s29] sm:$0xff]  ;;  %v864_v1 = vld [vmem:[%s165_s29 + $0x8] sm:$0xf]  ;;  %s749_s22 = smov 127   ;;  %s750_s30 = smov 126  }
  0x2a   : > { %193 = vst [vmem:[#allocation1] ss:$2 sm:$0xff] %v189_v0  ;;  %s751_s4 = smov 110   ;;  %s752_s5 = smov 109   ;;  %v361_v44 = vld [vmem:[%s990_s2] sm:$0xf] }
  0x2b   : > { %195 = vst [vmem:[#allocation1 + $0x10] ss:$2 sm:$0xff] %v864_v1  ;;  %s753_s6 = smov 108   ;;  %s754_s7 = smov 92   ;;  %v757_v46 = vmov 0   ;;  %vm347_vm0 = vcmask 1043456  }
  0x2c   : > { %s755_s8 = smov 91   ;;  %s756_s9 = smov 90   ;;  %649 = vset.pattern.permute.xlu2 %v757_v46  ;;  %650 = vset.pattern.permute.xlu0 %v757_v46  ;;  %vm270_vm1 = vcmask 891904   ;;  %vm326_vm2 = vcmask 744448   ;;  %vm344_vm3 = vcmask 736256   ;;  %vm233_vm4 = vcmask 1031168  }
  0x2d   : > { %vm307_vm5 = vcmask 752640   ;;  %vm289_vm6 = vcmask 883712   ;;  %vm367_vm7 = vcmask 293888   ;;  %vm252_vm8 = vcmask 900096   ;;  %s188_s20 = scalar_lea.vmem [#allocation5], %s557_s27  ;;  %s558_s26 = smul.u32 12, %s799_s16 }
  0x2e   : > { %vm215_vm9 = vcmask 1039360   ;;  %vm452_vm11 = vcmask 551936   ;;  %s455_s16 = scalar_lea.sflag [#allocation4], %s854_s25 }
  0x31   : > { %v867_v2 = vld.sshfl [vmem:[#allocation1] sm:$0xff pattern:$0x75316420]  ;;  %v869_v3 = vld.sshfl [vmem:[#allocation1 + $0x8] sm:$0xff pattern:$0x75316420] }
  0x32   : > { %203 = vst [vmem:[#allocation1 + $0x1] ss:$2 sm:$0xff] %v189_v0  ;;  %v871_v4 = vld.sshfl [vmem:[#allocation1 + $0x10] sm:$0xff pattern:$0x75316420] }
  0x33   : > { %205 = vst [vmem:[#allocation1 + $0x11] ss:$2 sm:$0xff] %v864_v1 }
  0x39   : > { %v874_v5 = vld.sshfl [vmem:[#allocation1] sm:$0xff pattern:$0x75316420]  ;;  %v207_v6 = vld.sshfl [vmem:[#allocation1 + $0x8] sm:$0xff pattern:$0x75316420] }
  0x3a   : > { %221 = vst [vmem:[#allocation1] ss:$2 sm:$0xff] %v189_v0  ;;  %v208_v7 = vld.sshfl [vmem:[#allocation1 + $0x10] sm:$0xff pattern:$0x75316420] }
  0x3b   : > { %223 = vst [vmem:[#allocation1 + $0x10] ss:$2 sm:$0xff] %v864_v1  ;;  %v614_v8 = vpack.i.bf16 %v207_v6, %v208_v7 }
  0x3d   : > { %615 = vrot.lane.b32.xlu2 %v614_v8, %s749_s22 }
  0x41   : > { %v224_v9 = vld.sshfl [vmem:[#allocation1] sm:$0xff pattern:$0x75316420]  ;;  %v225_v10 = vld.sshfl [vmem:[#allocation1 + $0x8] sm:$0xff pattern:$0x75316420] }
  0x42   : > { %240 = vst [vmem:[#allocation1 + $0x1] ss:$2 sm:$0xff] %v189_v0  ;;  %v226_v11 = vld.sshfl [vmem:[#allocation1 + $0x10] sm:$0xff pattern:$0x75316420] }
  0x43   : > { %242 = vst [vmem:[#allocation1 + $0x11] ss:$2 sm:$0xff] %v864_v1  ;;  %v619_v12 = vpack.i.bf16 %v225_v10, %v226_v11 }
  0x45   : > { %620 = vrot.lane.b32.xlu1 %v619_v12, %s750_s30 }
  0x49   : > { %v243_v13 = vld.sshfl [vmem:[#allocation1] sm:$0xff pattern:$0x75316420]  ;;  %v244_v14 = vld.sshfl [vmem:[#allocation1 + $0x8] sm:$0xff pattern:$0x75316420] }
  0x4a   : > { %258 = vst [vmem:[#allocation1] ss:$2 sm:$0xff] %v189_v0  ;;  %v245_v15 = vld.sshfl [vmem:[#allocation1 + $0x10] sm:$0xff pattern:$0x75316420] }
  0x4b   : > { %260 = vst [vmem:[#allocation1 + $0x10] ss:$2 sm:$0xff] %v864_v1  ;;  %v624_v16 = vpack.i.bf16 %v244_v14, %v245_v15 }
  0x4d   : > { %625 = vrot.lane.b32.xlu2 %v624_v16, %s751_s4 }
  0x51   : > { %v261_v17 = vld.sshfl [vmem:[#allocation1] sm:$0xff pattern:$0x75316420]  ;;  %v262_v18 = vld.sshfl [vmem:[#allocation1 + $0x8] sm:$0xff pattern:$0x75316420] }
  0x52   : > { %264 = vrot.lane.b32.xlu0 %v261_v17, %s752_s5  ;;  %277 = vst [vmem:[#allocation1 + $0x1] ss:$2 sm:$0xff] %v189_v0  ;;  %v263_v19 = vld.sshfl [vmem:[#allocation1 + $0x10] sm:$0xff pattern:$0x75316420] }
  0x53   : > { %279 = vst [vmem:[#allocation1 + $0x11] ss:$2 sm:$0xff] %v864_v1  ;;  %v629_v20 = vpack.i.bf16 %v262_v18, %v263_v19 }
  0x55   : > { %630 = vrot.lane.b32.xlu2 %v629_v20, %s752_s5 }
  0x59   : > { %v280_v21 = vld.sshfl [vmem:[#allocation1] sm:$0xff pattern:$0x75316420]  ;;  %v281_v22 = vld.sshfl [vmem:[#allocation1 + $0x8] sm:$0xff pattern:$0x75316420] }
  0x5a   : > { %v282_v23 = vld.sshfl [vmem:[#allocation1 + $0x10] sm:$0xff pattern:$0x75316420]  ;;  %295 = vst [vmem:[#allocation1] ss:$2 sm:$0xff] %v189_v0 }
  0x5b   : > { %297 = vst [vmem:[#allocation1 + $0x10] ss:$2 sm:$0xff] %v864_v1  ;;  %v634_v24 = vpack.i.bf16 %v281_v22, %v282_v23 }
  0x5d   : > { %635 = vrot.lane.b32.xlu2 %v634_v24, %s753_s6 }
  0x61   : > { %v299_v25 = vld.sshfl [vmem:[#allocation1 + $0x8] sm:$0xff pattern:$0x75316420]  ;;  %v298_v26 = vld.sshfl [vmem:[#allocation1] sm:$0xff pattern:$0x75316420] }
  0x62   : > { %v300_v27 = vld.sshfl [vmem:[#allocation1 + $0x10] sm:$0xff pattern:$0x75316420]  ;;  %314 = vst [vmem:[#allocation1 + $0x1] ss:$2 sm:$0xff] %v189_v0 }
  0x63   : > { %316 = vst [vmem:[#allocation1 + $0x11] ss:$2 sm:$0xff] %v864_v1  ;;  %v639_v28 = vpack.i.bf16 %v299_v25, %v300_v27 }
  0x65   : > { %640 = vrot.lane.b32.xlu0 %v639_v28, %s754_s7  ;;  %227 = vrot.lane.b32.xlu2 %v224_v9, %s750_s30  ;;  %v360_v9 = vld [vmem:[%s989_s1] sm:$0xf]  ;;  %s468_s30 = sshll.u32 %s188_s20, 4  ;;  %s469_s30 = int_to_ptr.vmem [resolvable:$true] %s468_s30 }
  0x69   : > { %v318_v29 = vld.sshfl [vmem:[#allocation1 + $0x8] sm:$0xff pattern:$0x75316420]  ;;  %v317_v30 = vld.sshfl [vmem:[#allocation1] sm:$0xff pattern:$0x75316420] }
  0x6a   : > { %v319_v31 = vld.sshfl [vmem:[#allocation1 + $0x10] sm:$0xff pattern:$0x75316420]  ;;  %332 = vst [vmem:[#allocation1] ss:$2 sm:$0xff] %v189_v0 }
  0x6b   : > { %v644_v32 = vpack.i.bf16 %v318_v29, %v319_v31  ;;  %334 = vst [vmem:[#allocation1 + $0x10] ss:$2 sm:$0xff] %v864_v1 }
  0x6d   : > { %301 = vrot.lane.b32.xlu0 %v298_v26, %s754_s7  ;;  %645 = vrot.lane.b32.xlu1 %v644_v32, %s755_s8 }
  0x6e   : > { %364 = vperm.xlu2 %649, %v361_v44  }
  0x71   : > { %v336_v34 = vld.sshfl [vmem:[#allocation1 + $0x8] sm:$0xff pattern:$0x75316420]  ;;  %v335_v35 = vld.sshfl [vmem:[#allocation1] sm:$0xff pattern:$0x75316420] }
  0x72   : > { %v337_v33 = vld.sshfl [vmem:[#allocation1 + $0x10] sm:$0xff pattern:$0x75316420] }
  0x75   : > { %342 = vrot.lane.b32.xlu0 %v337_v33, %s756_s9  ;;  %320 = vrot.lane.b32.xlu1 %v317_v30, %s755_s8  ;;  %s701_s8 = scalar_lea.hbm %s991_s3, 24 }
  0x7d   : > { %340 = vrot.lane.b32.xlu1 %v336_v34, %s756_s9  ;;  %338 = vrot.lane.b32.xlu0 %v335_v35, %s756_s9 }
  0x85   : > { %283 = vrot.lane.b32.xlu1 %v280_v21, %s753_s6  ;;  %246 = vrot.lane.b32.xlu0 %v243_v13, %s751_s4 }
  0x8d   : > { %209 = vrot.lane.b32.xlu1 %v874_v5, %s749_s22  ;;  %s466_s22 = scalar_lea.hbm %s991_s3, %s558_s26 }
  0x8e   : > { %s470_s4 = sshll.u32 %s466_s22, 4  ;;  %s471_s4 = int_to_ptr.hbm [resolvable:$true] %s470_s4 }
  0x8f   : > { %s695_s27 = sshra.s32 %s471_s4, 4  ;;  %s696_s27 = int_to_ptr.hbm [resolvable:$true] %s695_s27 }
  0x90   : > { %s697_s5 = scalar_lea.hbm %s696_s27, 12  ;;  %p702_p3 = scmp.lt.s32.totalorder %s696_s27, %s991_s3 }
  0x91   : > { %p698_p6 = scmp.ne.s32.totalorder %s696_s27, %s697_s5  ;;  %p703_p4 = scmp.lt.s32.totalorder %s701_s8, %s697_s5 }
  0x93   : > { %p699_p13 = pnand %p698_p6, %p824_p11  ;;  %p704_p5 = por %p703_p4, %p702_p3 }
  0x95   : > { %p700_p2 = pneg %p699_p13 }
  0x97   : > { %v890_v36 = vpop.permute.xlu2 %615  ;;  %p705_p7 = pnand %p704_p5, %p700_p2 }
  0x98   : > { %v617_v57 = vunpack.i.l.bf16 %v890_v36  ;;  %v618_v13 = vunpack.i.h.bf16 %v890_v36 }
  0x9a   : > { %v350_v7 = vsel %vm347_vm0, %v871_v4, %v617_v57  ;;  %v217_v21 = vsel %vm215_vm9, %v618_v13, %v617_v57 }
  0x9b   : > { %v349_v29 = vsel %vm347_vm0, %v869_v3, %v217_v21 }
  0xa7   : > { %v894_v38 = vpop.permute.xlu2 %625 }
  0xa8   : > { %v627_v53 = vunpack.i.l.bf16 %v894_v38  ;;  %v628_v59 = vunpack.i.h.bf16 %v894_v38 }
  0xaa   : > { %v254_v19 = vsel %vm252_vm8, %v628_v59, %v627_v53 }
  0xaf   : > { %v898_v41 = vpop.permute.xlu2 %630 }
  0xb0   : > { %v632_v47 = vunpack.i.l.bf16 %v898_v41  ;;  %v633_v60 = vunpack.i.h.bf16 %v898_v41 }
  0xb2   : > { %v272_v12 = vsel %vm270_vm1, %v633_v60, %v632_v47 }
  0xb7   : > { %v896_v39 = vpop.permute.xlu1 %620  ;;  %v903_v45 = vpop.permute.xlu2 %635 }
  0xb8   : > { %v637_v48 = vunpack.i.l.bf16 %v903_v45  ;;  %v622_v54 = vunpack.i.l.bf16 %v896_v39  ;;  %v638_v61 = vunpack.i.h.bf16 %v903_v45  ;;  %v623_v0 = vunpack.i.h.bf16 %v896_v39 }
  0xba   : > { %v356_v56 = vsel %vm347_vm0, %v632_v47, %v637_v48  ;;  %v353_v63 = vsel %vm347_vm0, %v622_v54, %v627_v53  ;;  %v291_v15 = vsel %vm289_vm6, %v638_v61, %v637_v48  ;;  %v235_v18 = vsel %vm233_vm4, %v623_v0, %v622_v54 }
  0xbb   : > { %v355_v20 = vsel %vm347_vm0, %v272_v12, %v291_v15  ;;  %v352_v23 = vsel %vm347_vm0, %v235_v18, %v254_v19 }
  0xbf   : > { %v228_v22 = vpop.permute.xlu2 %227 }
  0xc0   : > { %v234_v31 = vsel %vm233_vm4, %v228_v22, %v623_v0 }
  0xc4   : > { %v892_v37 = vpop.permute.xlu0 %264 }
  0xc5   : > { %v271_v26 = vsel %vm270_vm1, %v892_v37, %v633_v60 }
  0xc8   : > { %v365_v3 = vpop.permute.xlu2 %364 }
  0xd7   : > { %v641_v40 = vpop.permute.xlu0 %640 }
  0xd8   : > { %v642_v50 = vunpack.i.l.bf16 %v641_v40  ;;  %v643_v62 = vunpack.i.h.bf16 %v641_v40 }
  0xda   : > { %v309_v4 = vsel %vm307_vm5, %v643_v62, %v642_v50 }
  0xdf   : > { %v302_v42 = vpop.permute.xlu0 %301  ;;  %v646_v43 = vpop.permute.xlu1 %645 }
  0xe0   : > { %v647_v49 = vunpack.i.l.bf16 %v646_v43  ;;  %v648_v58 = vunpack.i.h.bf16 %v646_v43  ;;  %v308_v14 = vsel %vm307_vm5, %v302_v42, %v643_v62 }
  0xe2   : > { %v359_v55 = vsel %vm347_vm0, %v642_v50, %v647_v49  ;;  %v328_v8 = vsel %vm326_vm2, %v648_v58, %v647_v49 }
  0xe3   : > { %v358_v17 = vsel %vm347_vm0, %v309_v4, %v328_v8 }
  0xe7   : > { %v343_v51 = vpop.permute.xlu0 %342  ;;  %v321_v52 = vpop.permute.xlu1 %320 }
  0xe8   : > { %550 = vmatpush.msk.msra.mxu2 %vm347_vm0, %v343_v51  ;;  %v327_v1 = vsel %vm326_vm2, %v321_v52, %v648_v58 }
  0xe9   : > { %v357_v16 = vsel %vm347_vm0, %v308_v14, %v327_v1 }
  0xea   : > { %429 = vmatpush.msra.mxu2 %v359_v55 }
  0xec   : > { %430 = vmatpush.msra.mxu2 %v356_v56 }
  0xee   : > { %431 = vmatpush.msra.mxu2 %v353_v63 }
  0xef   : > { %v341_v5 = vpop.permute.xlu1 %340  ;;  %v339_v6 = vpop.permute.xlu0 %338 }
  0xf0   : > { %432 = vmatpush.msra.mxu2 %v350_v7  ;;  %v345_v10 = vsel %vm344_vm3, %v339_v6, %v341_v5  ;;  %v346_v11 = vsel %vm344_vm3, %v341_v5, %v343_v51 }
  0xf1   : > { %546 = vmatpush.msk.msra.mxu0 %vm347_vm0, %v345_v10  ;;  %548 = vmatpush.msk.msra.mxu1 %vm347_vm0, %v346_v11 }
  0xf2   : > { %551 = vmatmul.msk.f32.vlgmr.msra.gmra.mxu2 %vm367_vm7, %v360_v9 }
  0xf3   : > { %389 = vmatpush.msra.mxu0 %v357_v16  ;;  %409 = vmatpush.msra.mxu1 %v358_v17 }
  0xf5   : > { %410 = vmatpush.msra.mxu1 %v355_v20 }
  0xf7   : > { %411 = vmatpush.msra.mxu1 %v352_v23  ;;  %v284_v24 = vpop.permute.xlu1 %283  ;;  %v247_v25 = vpop.permute.xlu0 %246 }
  0xf8   : > { %v290_v27 = vsel %vm289_vm6, %v284_v24, %v638_v61  ;;  %v253_v28 = vsel %vm252_vm8, %v247_v25, %v628_v59 }
  0xf9   : > { %412 = vmatpush.msra.mxu1 %v349_v29  ;;  %v354_v30 = vsel %vm347_vm0, %v271_v26, %v290_v27  ;;  %v351_v32 = vsel %vm347_vm0, %v234_v31, %v253_v28 }
  0xfa   : > { %390 = vmatpush.msra.mxu0 %v354_v30  ;;  %549 = vmatmul.msk.f32.vlgmr.msra.gmra.mxu1 %vm367_vm7, %v360_v9 }
  0xfc   : > { %391 = vmatpush.msra.mxu0 %v351_v32 }
  0xff   : > { %v210_v33 = vpop.permute.xlu1 %209 }
 0x100   : > { %v216_v34 = vsel %vm215_vm9, %v210_v33, %v618_v13 }
 0x101   : > { %v348_v35 = vsel %vm347_vm0, %v867_v2, %v216_v34 }
 0x102   : > { %392 = vmatpush.msra.mxu0 %v348_v35 }
 0x103   : > { %547 = vmatmul.msk.f32.vlgmr.msra.gmra.mxu0 %vm367_vm7, %v360_v9 }
 0x175   : > { %v434_v36 = vpop.f32.mrf.mxu2 }
 0x176   : > { %v435_v37 = vadd.f32 %v434_v36, %v365_v3 }
 0x177   : > { %v414_v38 = vpop.f32.mrf.mxu1 }
 0x178   : > { %vm439_vm10 = vcmp.ge.f32.partialorder %v435_v37, 0.0  ;;  %v442_v39 = vmul.f32 0.1, %v435_v37  ;;  %v415_v40 = vadd.f32 %v414_v38, %v365_v3 }
 0x17a   : > { %v445_v41 = vsel %vm439_vm10, %v435_v37, %v442_v39  ;;  %v441_v42 = vmul.f32 0.1, %v415_v40  ;;  %vm438_vm12 = vcmp.ge.f32.partialorder %v415_v40, 0.0 }
 0x17b   : > { %453 = vst.msk [vmem:[%s188_s20 + $0x8] sm:$0xf] %vm452_vm11, %v445_v41 }
 0x17c   : > { %v444_v43 = vsel %vm438_vm12, %v415_v40, %v441_v42 }
 0x17d   : > { %v448_v46 = vrot.slane %v444_v43, 4 }
 0x180   : > { %v394_v2 = vpop.f32.mrf.mxu0 }
 0x181   : > { %v395_v44 = vadd.f32 %v394_v2, %v365_v3 }
 0x183   : > { %vm437_vm13 = vcmp.ge.f32.partialorder %v395_v44, 0.0  ;;  %v440_v45 = vmul.f32 0.1, %v395_v44 }
 0x185   : > { %v443_v47 = vsel %vm437_vm13, %v395_v44, %v440_v45 }
 0x186   : > { %v449_v48 = vsel %vm347_vm0, %v443_v47, %v448_v46 }
 0x187   : > { %451 = vst [vmem:[%s188_s20] sm:$0xff] %v449_v48 }
 0x188   : > { %708 = shalt.err (!%p705_p7)
}
 0x189   : > { %561 = dma.vmem_to_hbm [thread:$0]  (%p824_p11), %s469_s30, 192, %s471_s4, %s455_s16  }
 0x18a PF: > { %s482_s25 = sand.u32 1, %s735_s12   ;;  %p568_p8 = pnand %p543_p9, %p828_p12 }
 0x18b   : > { %s483_s11 = scalar_lea.sflag [#allocation4], %s482_s25 }
 0x18c   : > { %p569_p10 = pneg %p568_p8 }
 0x18e   : > { %730 = dma.done.wait (%p569_p10), %s483_s11, 192  }
 0x18f   : > { %732 = vsyncadd (%p569_p10), %s483_s11, 4294967104  ;;  %p16_p0 = scmp.ge.s32.totalorder %s803_s18, 4   ;;  %s996_s12 = smov %s739_s13 }
 0x190   : > { %s997_s13 = smov %s743_s14  ;;  %s998_s14 = smov %s815_s21 }
 0x191   : > { %s999_s15 = smov %s803_s18  ;;  %18 = sbr.rel (!%p16_p0) target bundleno = 5 (0x5), region = 90 }
 0x196   :  { %489 = vsyncpa [#allocation3], 1 }
 0x197   :  { %491 = vsyncpa [#allocation3 + $0x1], 1 }
 0x198   :  { %492 = vsyncpa [#allocation4], 1 }
 0x199   :  { %494 = vsyncpa [#allocation4 + $0x1], 1 }

</bundles_post_ra>
